<compile_context>
chip_gen: v7x
topology: tpu7x:2x2x1
jax: 0.10.0
libtpu: 0.0.40
codegen_flags: <defaults>
</compile_context>

<pallas_src>
import jax
import jax.numpy as jnp
from jax.experimental import pallas as pl
from jax.experimental.pallas import tpu as pltpu

# Model hyper-params (from the reference script: inp=20, out=50).
INP = 20      # nn.Linear(inp, 52)
H0 = 52
H1 = 26
OUT = 50      # nn.Linear(26, out)

LANE = 128                 # lane tile
MAX_TB = 1024              # max batch rows per grid step (multiple of 8)
MXU_DTYPE = jnp.float32    # set to jnp.bfloat16 on v5e for fewer MXU passes


def _round_up(n, m):
    return ((n + m - 1) // m) * m


def _pad2(x, rows, cols):
    r, c = x.shape
    return jnp.pad(x, ((0, rows - r), (0, cols - c)))


def _choose_tile(batch):
    """Balanced tile size: multiple of 8, <= MAX_TB, minimal row padding."""
    steps = -(-batch // MAX_TB)                  # ceil(B / MAX_TB)
    return _round_up(-(-batch // steps), 8)      # round_up(ceil(B/steps), 8)


def mymodel_kernel(x_ref, w_ref, b_ref, o_ref, xpad_ref):
    """Fused 3-layer MLP on one (TB, *) batch tile.

    x_ref    : [TB, INP]        batch tile at true feature width
    w_ref    : [3, 128, 128]    packed, transposed, zero-padded weights (resident)
    b_ref    : [3, 1, 128]      packed, zero-padded biases (resident)
    o_ref    : [TB, OUT]        output tile at true feature width
    xpad_ref : [TB, 128]        VMEM staging tile (lane-padded copy of x)
    """
    # Lane-pad the input tile inside VMEM.  Zero-fill every step so the result
    # is correct regardless of how the "parallel" grid is sharded across cores.
    xpad_ref[...] = jnp.zeros_like(xpad_ref)
    xpad_ref[:, :INP] = x_ref[...]

    h = xpad_ref[...]                                            # [TB, 128]

    # layer 0: 20 -> 52, ReLU
    h = jnp.dot(h.astype(w_ref.dtype), w_ref[0],
                preferred_element_type=jnp.float32) + b_ref[0]
    h = jnp.maximum(h, 0.0)
    # layer 1: 52 -> 26, ReLU
    h = jnp.dot(h.astype(w_ref.dtype), w_ref[1],
                preferred_element_type=jnp.float32) + b_ref[1]
    h = jnp.maximum(h, 0.0)
    # layer 2: 26 -> 50 (no activation)
    h = jnp.dot(h.astype(w_ref.dtype), w_ref[2],
                preferred_element_type=jnp.float32) + b_ref[2]

    o_ref[...] = h[:, :OUT]


def pack_params(params):
    """One-time prep (call once, OUTSIDE the per-step forward):
    transpose nn.Linear weights to [in, out], zero-pad to 128x128 / 1x128, and
    stack the 3 layers into single operands."""
    ws, bs = [], []
    for name in ("l0", "l1", "l2"):
        w, b = params[name]                    # w: [out_f, in_f], b: [out_f]
        ws.append(_pad2(w.T, LANE, LANE))      # [128, 128]
        bs.append(_pad2(b[None, :], 1, LANE))  # [1, 128]
    w_packed = jnp.stack(ws).astype(MXU_DTYPE)    # [3, 128, 128]
    b_packed = jnp.stack(bs).astype(jnp.float32)  # [3, 1, 128]
    return w_packed, b_packed


@jax.jit
def mymodel_forward(x, w_packed, b_packed):
    """x: [B, INP] float32 -> [B, OUT] float32."""
    B = x.shape[0]
    TB = _choose_tile(B)                        # rows per grid step
    B_pad = _round_up(B, TB)
    if B_pad != B:
        x = jnp.pad(x, ((0, B_pad - B), (0, 0)))   # row-only padding (<= 7 rows)

    out = pl.pallas_call(
        mymodel_kernel,
        out_shape=jax.ShapeDtypeStruct((B_pad, OUT), jnp.float32),
        grid_spec=pltpu.PrefetchScalarGridSpec(
            num_scalar_prefetch=0,
            grid=(B_pad // TB,),
            in_specs=[
                pl.BlockSpec((TB, INP), lambda i: (i, 0)),            # x tile
                pl.BlockSpec((3, LANE, LANE), lambda i: (0, 0, 0)),   # weights (resident)
                pl.BlockSpec((3, 1, LANE), lambda i: (0, 0, 0)),      # biases  (resident)
            ],
            out_specs=pl.BlockSpec((TB, OUT), lambda i: (i, 0)),
            scratch_shapes=[pltpu.VMEM((TB, LANE), jnp.float32)],
        ),
        compiler_params=pltpu.CompilerParams(
            dimension_semantics=("parallel",)),   # batch axis -> megacore on v7x
    )(x, w_packed, b_packed)

    return out if B_pad == B else out[:B]


def init_params(key):
    """Deterministic init mimicking nn.Linear defaults: U(-1/sqrt(fan_in), +)."""
    dims = [(INP, H0), (H0, H1), (H1, OUT)]
    params = {}
    for idx, (fan_in, fan_out) in enumerate(dims):
        key, kw, kb = jax.random.split(key, 3)
        bound = 1.0 / jnp.sqrt(float(fan_in))
        w = jax.random.uniform(kw, (fan_out, fan_in), jnp.float32, -bound, bound)
        b = jax.random.uniform(kb, (fan_out,), jnp.float32, -bound, bound)
        params[f"l{idx}"] = (w, b)
    return params


def reference_forward(x, params):
    """Pure-JAX reference of myModel.forward."""
    def lin(h, wb):
        w, b = wb
        return h @ w.T + b
    h = jnp.maximum(lin(x, params["l0"]), 0.0)
    h = jnp.maximum(lin(h, params["l1"]), 0.0)
    return lin(h, params["l2"])


if __name__ == "__main__":
    key = jax.random.PRNGKey(0)
    key, kx = jax.random.split(key)
    params = init_params(key)
    w_packed, b_packed = pack_params(params)

    tol = 2e-4 if MXU_DTYPE == jnp.float32 else 2e-2

    # Small latency-style batch (single grid step).
    x_small = jax.random.normal(kx, (8, INP), jnp.float32)
    y_small = mymodel_forward(x_small, w_packed, b_packed)
    jax.block_until_ready(y_small)
    assert y_small.shape == (8, OUT)
    assert jnp.allclose(y_small, reference_forward(x_small, params),
                        atol=tol, rtol=tol)

    # Ragged batch exercising the tiled / row-padded path (grid > 1 step).
    key, kx2 = jax.random.split(key)
    x_big = jax.random.normal(kx2, (1037, INP), jnp.float32)
    y_big = mymodel_forward(x_big, w_packed, b_packed)
    jax.block_until_ready(y_big)
    assert y_big.shape == (1037, OUT)
    assert jnp.allclose(y_big, reference_forward(x_big, params),
                        atol=tol, rtol=tol)

    print("KERNEL_OK")
</pallas_src>

<mosaic_0001>
module attributes {stable_mosaic.version = 11 : i64} {
  func.func @mymodel_kernel(%arg0: i32, %arg1: memref<8x20xf32, #tpu.memory_space<vmem>>, %arg2: memref<3x128x128xf32, #tpu.memory_space<vmem>>, %arg3: memref<3x1x128xf32, #tpu.memory_space<vmem>>, %arg4: memref<8x50xf32, #tpu.memory_space<vmem>>, %arg5: memref<8x128xf32, #tpu.memory_space<vmem>>) attributes {dimension_semantics = [#tpu.dimension_semantics<parallel>], iteration_bounds = array<i64: 1>, scalar_prefetch = 0 : i64, scratch_operands = 1 : i64, tpu.core_type = #tpu.core_type<tc>, window_params = [{transform_indices = @transform_0, window_bounds = array<i64: 8, 20>}, {pipeline_mode = #tpu.pipeline_mode<synchronous>, transform_indices = @transform_1, window_bounds = array<i64: 3, 128, 128>}, {pipeline_mode = #tpu.pipeline_mode<synchronous>, transform_indices = @transform_2, window_bounds = array<i64: 3, 1, 128>}, {transform_indices = @transform_3, window_bounds = array<i64: 8, 50>}]} {
    %cst = arith.constant 0.000000e+00 : f32
    %0 = vector.broadcast %cst : f32 to vector<8x128xf32>
    %c0 = arith.constant 0 : index
    %c0_0 = arith.constant 0 : index
    %1 = vector.load %arg5[%c0, %c0_0] : memref<8x128xf32, #tpu.memory_space<vmem>>, vector<8x128xf32>
    tpu.vector_store %arg5[%c0, %c0_0], %0 {strides = array<i32>} : memref<8x128xf32, #tpu.memory_space<vmem>>, vector<8x128xf32>,
    %c0_1 = arith.constant 0 : index
    %c0_2 = arith.constant 0 : index
    %2 = vector.load %arg1[%c0_1, %c0_2] : memref<8x20xf32, #tpu.memory_space<vmem>>, vector<8x20xf32>
    %c0_3 = arith.constant 0 : index
    %c0_4 = arith.constant 0 : index
    %3 = vector.load %arg5[%c0_3, %c0_4] : memref<8x128xf32, #tpu.memory_space<vmem>>, vector<8x20xf32>
    tpu.vector_store %arg5[%c0_3, %c0_4], %2 {strides = array<i32>} : memref<8x128xf32, #tpu.memory_space<vmem>>, vector<8x20xf32>,
    %c0_5 = arith.constant 0 : index
    %c0_6 = arith.constant 0 : index
    %4 = vector.load %arg5[%c0_5, %c0_6] : memref<8x128xf32, #tpu.memory_space<vmem>>, vector<8x128xf32>
    %c0_7 = arith.constant 0 : index
    %c0_8 = arith.constant 0 : index
    %c0_9 = arith.constant 0 : index
    %5 = vector.load %arg2[%c0_7, %c0_8, %c0_9] : memref<3x128x128xf32, #tpu.memory_space<vmem>>, vector<1x128x128xf32>
    %6 = vector.shape_cast %5 : vector<1x128x128xf32> to vector<128x128xf32>
    %cst_10 = arith.constant dense<0.000000e+00> : vector<8x128xf32>
    %7 = tpu.matmul %4, %6, %cst_10 {dimension_numbers = #tpu.dot_dimension_numbers<[1], [0], [0], [1], [0, 0, 1, 1], [], []>} : vector<8x128xf32>, vector<128x128xf32>, vector<8x128xf32> -> vector<8x128xf32>
    %c0_11 = arith.constant 0 : index
    %c0_12 = arith.constant 0 : index
    %c0_13 = arith.constant 0 : index
    %8 = vector.load %arg3[%c0_11, %c0_12, %c0_13] : memref<3x1x128xf32, #tpu.memory_space<vmem>>, vector<1x1x128xf32>
    %9 = vector.shape_cast %8 : vector<1x1x128xf32> to vector<1x128xf32>
    %10 = vector.broadcast %9 : vector<1x128xf32> to vector<8x128xf32>
    %11 = arith.addf %7, %10 : vector<8x128xf32>
    %cst_14 = arith.constant 0.000000e+00 : f32
    %12 = vector.broadcast %cst_14 : f32 to vector<8x128xf32>
    %13 = arith.maximumf %11, %12 : vector<8x128xf32>
    %c1 = arith.constant 1 : index
    %c0_15 = arith.constant 0 : index
    %c0_16 = arith.constant 0 : index
    %14 = vector.load %arg2[%c1, %c0_15, %c0_16] : memref<3x128x128xf32, #tpu.memory_space<vmem>>, vector<1x128x128xf32>
    %15 = vector.shape_cast %14 : vector<1x128x128xf32> to vector<128x128xf32>
    %cst_17 = arith.constant dense<0.000000e+00> : vector<8x128xf32>
    %16 = tpu.matmul %13, %15, %cst_17 {dimension_numbers = #tpu.dot_dimension_numbers<[1], [0], [0], [1], [0, 0, 1, 1], [], []>} : vector<8x128xf32>, vector<128x128xf32>, vector<8x128xf32> -> vector<8x128xf32>
    %c1_18 = arith.constant 1 : index
    %c0_19 = arith.constant 0 : index
    %c0_20 = arith.constant 0 : index
    %17 = vector.load %arg3[%c1_18, %c0_19, %c0_20] : memref<3x1x128xf32, #tpu.memory_space<vmem>>, vector<1x1x128xf32>
    %18 = vector.shape_cast %17 : vector<1x1x128xf32> to vector<1x128xf32>
    %19 = vector.broadcast %18 : vector<1x128xf32> to vector<8x128xf32>
    %20 = arith.addf %16, %19 : vector<8x128xf32>
    %cst_21 = arith.constant 0.000000e+00 : f32
    %21 = vector.broadcast %cst_21 : f32 to vector<8x128xf32>
    %22 = arith.maximumf %20, %21 : vector<8x128xf32>
    %c2 = arith.constant 2 : index
    %c0_22 = arith.constant 0 : index
    %c0_23 = arith.constant 0 : index
    %23 = vector.load %arg2[%c2, %c0_22, %c0_23] : memref<3x128x128xf32, #tpu.memory_space<vmem>>, vector<1x128x128xf32>
    %24 = vector.shape_cast %23 : vector<1x128x128xf32> to vector<128x128xf32>
    %cst_24 = arith.constant dense<0.000000e+00> : vector<8x128xf32>
    %25 = tpu.matmul %22, %24, %cst_24 {dimension_numbers = #tpu.dot_dimension_numbers<[1], [0], [0], [1], [0, 0, 1, 1], [], []>} : vector<8x128xf32>, vector<128x128xf32>, vector<8x128xf32> -> vector<8x128xf32>
    %c2_25 = arith.constant 2 : index
    %c0_26 = arith.constant 0 : index
    %c0_27 = arith.constant 0 : index
    %26 = vector.load %arg3[%c2_25, %c0_26, %c0_27] : memref<3x1x128xf32, #tpu.memory_space<vmem>>, vector<1x1x128xf32>
    %27 = vector.shape_cast %26 : vector<1x1x128xf32> to vector<1x128xf32>
    %28 = vector.broadcast %27 : vector<1x128xf32> to vector<8x128xf32>
    %29 = arith.addf %25, %28 : vector<8x128xf32>
    %30 = vector.extract_strided_slice %29 {offsets = [0, 0], sizes = [8, 50], strides = [1, 1]} : vector<8x128xf32> to vector<8x50xf32>
    %c0_28 = arith.constant 0 : index
    %c0_29 = arith.constant 0 : index
    %31 = vector.load %arg4[%c0_28, %c0_29] : memref<8x50xf32, #tpu.memory_space<vmem>>, vector<8x50xf32>
    tpu.vector_store %arg4[%c0_28, %c0_29], %30 {strides = array<i32>} : memref<8x50xf32, #tpu.memory_space<vmem>>, vector<8x50xf32>,
    return
  }
  func.func @transform_0(%arg0: i32) -> (i32, i32) {
    %c0_i32 = arith.constant 0 : i32
    %c0_i32_0 = arith.constant 0 : i32
    return %arg0, %c0_i32 : i32, i32
  }
  func.func @transform_1(%arg0: i32) -> (i32, i32, i32) {
    %c0_i32 = arith.constant 0 : i32
    %c0_i32_0 = arith.constant 0 : i32
    %c0_i32_1 = arith.constant 0 : i32
    %c0_i32_2 = arith.constant 0 : i32
    return %c0_i32, %c0_i32_0, %c0_i32_1 : i32, i32, i32
  }
  func.func @transform_2(%arg0: i32) -> (i32, i32, i32) {
    %c0_i32 = arith.constant 0 : i32
    %c0_i32_0 = arith.constant 0 : i32
    %c0_i32_1 = arith.constant 0 : i32
    %c0_i32_2 = arith.constant 0 : i32
    return %c0_i32, %c0_i32_0, %c0_i32_1 : i32, i32, i32
  }
  func.func @transform_3(%arg0: i32) -> (i32, i32) {
    %c0_i32 = arith.constant 0 : i32
    %c0_i32_0 = arith.constant 0 : i32
    return %arg0, %c0_i32 : i32, i32
  }
}

</mosaic_0001>

<bundles_post_ra>
// kernel: mymodel_forward.1
= control target key start
LH: loop header
LB: loop body
LE: loop exit
PB: predicated region body
PF: predicated region fallthrough
CT: control target
= control target key end

     0   :  { %8 = vsyncpa [#allocation4], 0  ;;  %s773_s0 = inlined_call_operand.hbm [shape: f32[8,20], index: 0, kind: input, shape index: {}]   ;;  %s774_s1 = inlined_call_operand.hbm [shape: f32[3,128,128], index: 1, kind: input, shape index: {}]   ;;  %s775_s2 = inlined_call_operand.vmem [shape: f32[3,1,128], index: 2, kind: input, shape index: {}]   ;;  %s776_s3 = inlined_call_operand.hbm [shape: f32[8,50], index: 3, kind: output, shape index: {}]  }
   0x1   :  { %9 = vsyncpa [#allocation7], 0 }
   0x2   :  { %10 = vsyncpa [#allocation5], 0  ;;  %s662_s12 = smov [#allocation3]   ;;  %s663_s14 = smov [#allocation6]  }
   0x3   :  { %s17_s13 = sshll.u32 %s662_s12, 4  ;;  %s26_s15 = sshll.u32 %s663_s14, 4  ;;  %s18_s13 = int_to_ptr.vmem [resolvable:$true] %s17_s13  ;;  %s690_s15 = int_to_ptr.vmem [resolvable:$true] %s26_s15 }
   0x4   :  { %s590_s18 = scalar_lea.hbm %s773_s0, 128 }
   0x5   :  { %p591_p0 = scmp.ne.s32.totalorder %s773_s0, %s590_s18  ;;  %p594_p1 = scmp.lt.u32.totalorder %s590_s18, %s773_s0 }
   0x7   :  { %p596_p2 = pnand %p594_p1, %p591_p0 }
   0x9   :  { %599 = shalt.err (!%p596_p2)
}
   0xa   :  { %s600_s23 = scalar_lea.vmem %s18_s13, 128  ;;  %p605_p4 = scmp.lt.s32.totalorder %s18_s13, %s18_s13 }
   0xb   :  { %p601_p3 = scmp.ne.s32.totalorder %s18_s13, %s600_s23  ;;  %p606_p5 = scmp.lt.s32.totalorder %s600_s23, %s600_s23 }
   0xd   :  { %p607_p6 = por %p606_p5, %p605_p4 }
   0xf   :  { %p608_p7 = pnand %p607_p6, %p601_p3 }
  0x11   :  { %611 = shalt.err (!%p608_p7)
}
  0x12   :  { %20 = dma.hbm_to_vmem [thread:$0]  %s773_s0, 128, %s18_s13, [#allocation4]  }
  0x13   :  { %s612_s28 = scalar_lea.hbm %s774_s1, 6144 }
  0x14   :  { %p613_p8 = scmp.ne.s32.totalorder %s774_s1, %s612_s28  ;;  %p616_p9 = scmp.lt.u32.totalorder %s612_s28, %s774_s1 }
  0x16   :  { %p618_p10 = pnand %p616_p9, %p613_p8 }
  0x18   :  { %621 = shalt.err (!%p618_p10)
}
  0x19   :  { %s622_s6 = scalar_lea.vmem %s690_s15, 6144  ;;  %p627_p12 = scmp.lt.s32.totalorder %s690_s15, %s690_s15 }
  0x1a   :  { %p623_p11 = scmp.ne.s32.totalorder %s690_s15, %s622_s6  ;;  %p628_p13 = scmp.lt.s32.totalorder %s622_s6, %s622_s6 }
  0x1c   :  { %p629_p0 = por %p628_p13, %p627_p12 }
  0x1e   :  { %p630_p1 = pnand %p629_p0, %p623_p11 }
  0x20   :  { %633 = shalt.err (!%p630_p1)
}
  0x21   :  { %s664_s0 = smov 128   ;;  %s665_s7 = smov 8  }
  0x22   :  { %32 = dma.hbm_to_vmem [thread:$0]  %s774_s1, 6144, %s690_s15, [#allocation7], %s664_s0, %s664_s0, %s665_s7  }
  0x23   :  { %656 = dma.done.wait [#allocation4], 128  }
  0x24   :  { %657 = vsyncadd [#allocation4], 4294967168 }
  0x25   :  { %658 = dma.done.wait [#allocation7], 6144  }
  0x26   :  { %659 = vsyncadd [#allocation7], 4294961152  ;;  %v666_v0 = vmov 0.0|0.0   ;;  %v667_v1 = vmov 0.0   ;;  %vm668_vm0 = vmmov 0   ;;  %v46_v2 = vld [vmem:[#allocation6] sm:$0xff] }
  0x27   :  { %510 = vmatprep.subr.bf16.mxu0 %v666_v0  ;;  %41 = vst [vmem:[#allocation2] sm:$0xff] %v667_v1  ;;  %437 = vmatprep.mubr.msk.f32.mxu0 %vm668_vm0, %v667_v1  ;;  %v47_v3 = vld [vmem:[#allocation6 + $0x8] sm:$0xff]  ;;  %v48_v4 = vld [vmem:[#allocation6 + $0x10] sm:$0xff]  ;;  %v49_v6 = vld [vmem:[#allocation6 + $0x18] sm:$0xff]  ;;  %vm43_vm1 = vcmask 162816   ;;  %s669_s15 = smov [#allocation8]  }
  0x28   :  { %534 = vmatprep.subr.bf16.mxu1 %v666_v0  ;;  %472 = vmatprep.mubr.msk.f32.mxu1 %vm668_vm0, %v667_v1  ;;  %v511_v5 = vpack.c.bf16 %v47_v3, %v46_v2  ;;  %v514_v7 = vpack.c.bf16 %v49_v6, %v48_v4  ;;  %v50_v8 = vld [vmem:[#allocation6 + $0x20] sm:$0xff]  ;;  %v51_v9 = vld [vmem:[#allocation6 + $0x28] sm:$0xff]  ;;  %v42_v10 = vld [vmem:[#allocation3] sm:$0xff]  ;;  %s339_s16 = sshll.u32 %s669_s15, 4  ;;  %vm331_vm2 = vcmask 408576   ;;  %s340_s16 = int_to_ptr.vmem [resolvable:$true] %s339_s16 }
  0x29   :  { %v141_v11 = vld [vmem:[#allocation6 + $0x80] sm:$0xff]  ;;  %44 = vst.msk [vmem:[#allocation2] sm:$0xff] %vm43_vm1, %v42_v10  ;;  %v142_v12 = vld [vmem:[#allocation6 + $0x88] sm:$0xff]  ;;  %v143_v13 = vld [vmem:[#allocation6 + $0x90] sm:$0xff]  ;;  %v517_v15 = vpack.c.bf16 %v51_v9, %v50_v8  ;;  %s634_s17 = scalar_lea.vmem %s340_s16, 128  ;;  %p639_p3 = scmp.lt.s32.totalorder %s340_s16, %s340_s16 }
  0x2a   :  { %512 = vmatpush3.bf16.msra.mxu0 %v511_v5  ;;  %v144_v14 = vld [vmem:[#allocation6 + $0x98] sm:$0xff]  ;;  %v535_v16 = vpack.c.bf16 %v142_v12, %v141_v11  ;;  %v52_v17 = vld [vmem:[#allocation6 + $0x30] sm:$0xff]  ;;  %v145_v20 = vld [vmem:[#allocation6 + $0xa0] sm:$0xff]  ;;  %p635_p2 = scmp.ne.s32.totalorder %s340_s16, %s634_s17  ;;  %p640_p4 = scmp.lt.s32.totalorder %s634_s17, %s634_s17 }
  0x2b   :  { %513 = vmatprep.subr.bf16.mxu0 %v666_v0  ;;  %v53_v18 = vld [vmem:[#allocation6 + $0x38] sm:$0xff]  ;;  %v538_v19 = vpack.c.bf16 %v144_v14, %v143_v13  ;;  %v146_v21 = vld [vmem:[#allocation6 + $0xa8] sm:$0xff]  ;;  %v54_v23 = vld [vmem:[#allocation6 + $0x40] sm:$0xff] }
  0x2c   :  { %536 = vmatpush3.bf16.msra.mxu1 %v535_v16  ;;  %v520_v22 = vpack.c.bf16 %v53_v18, %v52_v17  ;;  %v55_v24 = vld [vmem:[#allocation6 + $0x48] sm:$0xff]  ;;  %v541_v25 = vpack.c.bf16 %v146_v21, %v145_v20  ;;  %v147_v26 = vld [vmem:[#allocation6 + $0xb0] sm:$0xff]  ;;  %v148_v27 = vld [vmem:[#allocation6 + $0xb8] sm:$0xff]  ;;  %p641_p5 = por %p640_p4, %p639_p3 }
  0x2d   :  { %537 = vmatprep.subr.bf16.mxu1 %v666_v0  ;;  %v523_v28 = vpack.c.bf16 %v55_v24, %v54_v23  ;;  %v56_v29 = vld [vmem:[#allocation6 + $0x50] sm:$0xff]  ;;  %v57_v30 = vld [vmem:[#allocation6 + $0x58] sm:$0xff]  ;;  %v544_v31 = vpack.c.bf16 %v148_v27, %v147_v26  ;;  %v149_v32 = vld [vmem:[#allocation6 + $0xc0] sm:$0xff] }
  0x2e   :  { %515 = vmatpush3.bf16.msra.mxu0 %v514_v7  ;;  %v150_v33 = vld [vmem:[#allocation6 + $0xc8] sm:$0xff]  ;;  %v526_v34 = vpack.c.bf16 %v57_v30, %v56_v29  ;;  %v58_v35 = vld [vmem:[#allocation6 + $0x60] sm:$0xff]  ;;  %v151_v38 = vld [vmem:[#allocation6 + $0xd0] sm:$0xff]  ;;  %p642_p6 = pnand %p641_p5, %p635_p2 }
  0x2f   :  { %516 = vmatprep.subr.bf16.mxu0 %v666_v0  ;;  %v59_v36 = vld [vmem:[#allocation6 + $0x68] sm:$0xff]  ;;  %v547_v37 = vpack.c.bf16 %v150_v33, %v149_v32  ;;  %v152_v39 = vld [vmem:[#allocation6 + $0xd8] sm:$0xff]  ;;  %v60_v41 = vld [vmem:[#allocation6 + $0x70] sm:$0xff] }
  0x30   :  { %539 = vmatpush3.bf16.msra.mxu1 %v538_v19  ;;  %v529_v40 = vpack.c.bf16 %v59_v36, %v58_v35  ;;  %v61_v42 = vld [vmem:[#allocation6 + $0x78] sm:$0xff]  ;;  %v550_v43 = vpack.c.bf16 %v152_v39, %v151_v38  ;;  %v153_v44 = vld [vmem:[#allocation6 + $0xe0] sm:$0xff]  ;;  %v154_v45 = vld [vmem:[#allocation6 + $0xe8] sm:$0xff] }
  0x31   :  { %540 = vmatprep.subr.bf16.mxu1 %v666_v0  ;;  %v532_v46 = vpack.c.bf16 %v61_v42, %v60_v41  ;;  %v553_v47 = vpack.c.bf16 %v154_v45, %v153_v44  ;;  %v45_v48 = vld [vmem:[#allocation2] sm:$0xff]  ;;  %v156_v50 = vld [vmem:[#allocation6 + $0xf8] sm:$0xff]  ;;  %v237_v52 = vld [vmem:[#allocation6 + $0x100] sm:$0xff] }
  0x32   :  { %518 = vmatpush3.bf16.msra.mxu0 %v517_v15  ;;  %v155_v49 = vld [vmem:[#allocation6 + $0xf0] sm:$0xff]  ;;  %v238_v53 = vld [vmem:[#allocation6 + $0x108] sm:$0xff]  ;;  %v240_v56 = vld [vmem:[#allocation6 + $0x118] sm:$0xff] }
  0x33   :  { %519 = vmatprep.subr.bf16.mxu0 %v666_v0  ;;  %v556_v51 = vpack.c.bf16 %v156_v50, %v155_v49  ;;  %v239_v54 = vld [vmem:[#allocation6 + $0x110] sm:$0xff]  ;;  %v559_v55 = vpack.c.bf16 %v238_v53, %v237_v52  ;;  %v241_v58 = vld [vmem:[#allocation6 + $0x120] sm:$0xff]  ;;  %v242_v59 = vld [vmem:[#allocation6 + $0x128] sm:$0xff] }
  0x34   :  { %542 = vmatpush3.bf16.msra.mxu1 %v541_v25  ;;  %v562_v57 = vpack.c.bf16 %v240_v56, %v239_v54  ;;  %v565_v60 = vpack.c.bf16 %v242_v59, %v241_v58  ;;  %v243_v61 = vld [vmem:[#allocation6 + $0x130] sm:$0xff]  ;;  %v244_v62 = vld [vmem:[#allocation6 + $0x138] sm:$0xff]  ;;  %v246_v2 = vld [vmem:[#allocation6 + $0x148] sm:$0xff] }
  0x35   :  { %543 = vmatprep.subr.bf16.mxu1 %v666_v0  ;;  %v568_v63 = vpack.c.bf16 %v244_v62, %v243_v61  ;;  %v247_v4 = vld [vmem:[#allocation6 + $0x150] sm:$0xff]  ;;  %v248_v5 = vld [vmem:[#allocation6 + $0x158] sm:$0xff]  ;;  %v249_v7 = vld [vmem:[#allocation6 + $0x160] sm:$0xff] }
  0x36   :  { %521 = vmatpush3.bf16.msra.mxu0 %v520_v22  ;;  %v574_v6 = vpack.c.bf16 %v248_v5, %v247_v4  ;;  %v250_v8 = vld [vmem:[#allocation6 + $0x168] sm:$0xff]  ;;  %v349_v10 = vld [vmem:[%s775_s2] ss:$0 sm:$0xff]  ;;  %v252_v16 = vld [vmem:[#allocation6 + $0x178] sm:$0xff] }
  0x37   :  { %522 = vmatprep.subr.bf16.mxu0 %v666_v0  ;;  %v577_v9 = vpack.c.bf16 %v250_v8, %v249_v7  ;;  %v251_v15 = vld [vmem:[#allocation6 + $0x170] sm:$0xff] }
  0x38   :  { %545 = vmatpush3.bf16.msra.mxu1 %v544_v31  ;;  %v580_v17 = vpack.c.bf16 %v252_v16, %v251_v15  ;;  %v351_v18 = vld [vmem:[%s775_s2 + $0x1] ss:$0 sm:$0xff]  ;;  %v353_v22 = vld [vmem:[%s775_s2 + $0x2] ss:$0 sm:$0xff] }
  0x39   :  { %546 = vmatprep.subr.bf16.mxu1 %v666_v0 }
  0x3a   :  { %524 = vmatpush3.bf16.msra.mxu0 %v523_v28 }
  0x3b   :  { %525 = vmatprep.subr.bf16.mxu0 %v666_v0 }
  0x3c   :  { %548 = vmatpush3.bf16.msra.mxu1 %v547_v37 }
  0x3d   :  { %549 = vmatprep.subr.bf16.mxu1 %v666_v0 }
  0x3e   :  { %527 = vmatpush3.bf16.msra.mxu0 %v526_v34 }
  0x3f   :  { %528 = vmatprep.subr.bf16.mxu0 %v666_v0 }
  0x40   :  { %551 = vmatpush3.bf16.msra.mxu1 %v550_v43 }
  0x41   :  { %552 = vmatprep.subr.bf16.mxu1 %v666_v0 }
  0x42   :  { %530 = vmatpush3.bf16.msra.mxu0 %v529_v40 }
  0x43   :  { %531 = vmatprep.subr.bf16.mxu0 %v666_v0 }
  0x44   :  { %554 = vmatpush3.bf16.msra.mxu1 %v553_v47 }
  0x45   :  { %555 = vmatprep.subr.bf16.mxu1 %v666_v0 }
  0x46   :  { %533 = vmatpush3.bf16.msra.mxu0 %v532_v46 }
  0x47   :  { %558 = vmatprep.subr.bf16.mxu0 %v666_v0 }
  0x48   :  { %557 = vmatpush3.bf16.msra.mxu1 %v556_v51 }
  0x49   :  { %438 = vmatmul.mubr.f32.vlgmr.msra.gmra.mrb[0].mxu0 %v45_v48 }
  0x4a   :  { %507 = vmatprep.mubr.msk.f32.mxu0 %vm668_vm0, %v667_v1  ;;  %560 = vmatpush3.bf16.msra.mxu0 %v559_v55  ;;  %v245_v1 = vld [vmem:[#allocation6 + $0x140] sm:$0xff] }
  0x4b   :  { %561 = vmatprep.subr.bf16.mxu0 %v666_v0  ;;  %v571_v3 = vpack.c.bf16 %v246_v2, %v245_v1 }
  0x4e   :  { %563 = vmatpush3.bf16.msra.mxu0 %v562_v57 }
  0x4f   :  { %564 = vmatprep.subr.bf16.mxu0 %v666_v0 }
  0x52   :  { %566 = vmatpush3.bf16.msra.mxu0 %v565_v60 }
  0x53   :  { %567 = vmatprep.subr.bf16.mxu0 %v666_v0 }
  0x56   :  { %569 = vmatpush3.bf16.msra.mxu0 %v568_v63 }
  0x57   :  { %570 = vmatprep.subr.bf16.mxu0 %v666_v0 }
  0x5a   :  { %572 = vmatpush3.bf16.msra.mxu0 %v571_v3 }
  0x5b   :  { %573 = vmatprep.subr.bf16.mxu0 %v666_v0 }
  0x5e   :  { %575 = vmatpush3.bf16.msra.mxu0 %v574_v6 }
  0x5f   :  { %576 = vmatprep.subr.bf16.mxu0 %v666_v0 }
  0x62   :  { %578 = vmatpush3.bf16.msra.mxu0 %v577_v9 }
  0x63   :  { %579 = vmatprep.subr.bf16.mxu0 %v666_v0 }
  0x66   :  { %581 = vmatpush3.bf16.msra.mxu0 %v580_v17 }
 0x11c   :  { %v135_v11 = vpop.f32.mrb[0].mxu0 }
 0x11d   :  { %v136_v12 = vadd.f32 %v349_v10, %v135_v11  ;;  %v439_v13 = vpop.f32.mrb[1].mxu0 }
 0x11f   :  { %v139_v14 = vmax.f32 %v136_v12, 0.0 }
 0x121   :  { %473 = vmatmul.mubr.f32.vlgmr.msra.gmra.mrb[0].mxu1 %v139_v14 }
 0x1f4   :  { %v231_v19 = vpop.f32.mrb[0].mxu1 }
 0x1f5   :  { %v232_v20 = vadd.f32 %v351_v18, %v231_v19  ;;  %v474_v0 = vpop.f32.mrb[1].mxu1 }
 0x1f7   :  { %v235_v21 = vmax.f32 %v232_v20, 0.0 }
 0x1f9   :  { %508 = vmatmul.mubr.f32.vlgmr.msra.gmra.mrb[2].mxu0 %v235_v21 }
 0x2cc   :  { %v327_v23 = vpop.f32.mrb[2].mxu0 }
 0x2cd   :  { %v328_v24 = vadd.f32 %v353_v22, %v327_v23  ;;  %v509_v25 = vpop.f32.mrb[3].mxu0 }
 0x2cf   :  { %332 = vst.msk [vmem:[#allocation8] sm:$0xff] %vm331_vm2, %v328_v24 }
 0x2d0   :  { %645 = shalt.err (!%p642_p6)
}
 0x2d1   :  { %s646_s20 = scalar_lea.hbm %s776_s3, 128 }
 0x2d2   :  { %p647_p7 = scmp.ne.s32.totalorder %s776_s3, %s646_s20  ;;  %p650_p8 = scmp.lt.u32.totalorder %s646_s20, %s776_s3 }
 0x2d4   :  { %p652_p9 = pnand %p650_p8, %p647_p7 }
 0x2d6   :  { %655 = shalt.err (!%p652_p9)
}
 0x2d7   :  { %342 = dma.vmem_to_hbm [thread:$0]  %s340_s16, 128, %s776_s3, [#allocation5]  }
 0x2d8   :  { %660 = dma.done.wait [#allocation5], 128  }
 0x2d9   :  { %661 = vsyncadd [#allocation5], 4294967168 }
 0x2da   :  { %346 = vsyncpa [#allocation4], 1 }
 0x2db   :  { %347 = vsyncpa [#allocation7], 1 }
 0x2dc   :  { %348 = vsyncpa [#allocation5], 1 }

</bundles_post_ra>
